<compile_context>
chip_gen: v7x
topology: tpu7x:2x2x1
jax: 0.10.0
libtpu: 0.0.40
codegen_flags: <defaults>
</compile_context>

<pallas_src>
import functools

import jax
import jax.numpy as jnp
from jax import lax
from jax.experimental import pallas as pl
from jax.experimental.pallas import tpu as pltpu

EPS = 1e-5          # nn.InstanceNorm2d default eps
ALPHA = 0.15        # LeakyReLU negative slope


def _conv_in_lrelu_kernel(x_ref, w_ref, b_ref, m_ref, o_ref, *, offs, flo, inv_hw):
    # x_ref: (Cin, FL)        zero-padded, row-flattened input, one batch elem
    # w_ref: (KH*KW, Cout, Cin)  per-tap weight matrices, tap t = i*KW + j
    # b_ref: (Cout, 1)        conv bias
    # m_ref: (1, FLO)         1.0 on valid (non-pad) output columns, else 0.0
    # o_ref: (Cout, FLO)      channel-major output, FLO = H * (W + 2*pad) lanes
    y = None
    for t, off in enumerate(offs):              # statically unrolled 3x3 taps
        xs = x_ref[:, pl.ds(off, flo)]          # (Cin, FLO) static lane slice
        part = jnp.dot(w_ref[t], xs, preferred_element_type=jnp.float32)
        y = part if y is None else y + part
    y = y + b_ref[...]                          # (Cout, FLO) + (Cout, 1)

    # InstanceNorm2d (affine=False, biased variance) over valid spatial cols.
    m = m_ref[...]                              # (1, FLO)
    mean = jnp.sum(y * m, axis=1, keepdims=True) * inv_hw        # (Cout, 1)
    centered = y - mean                         # reused for var AND normalize
    cm = centered * m
    var = jnp.sum(cm * cm, axis=1, keepdims=True) * inv_hw       # (Cout, 1)
    yn = centered * lax.rsqrt(var + EPS)

    # LeakyReLU(0.15), fused
    o_ref[...] = jnp.where(yn >= 0, yn, ALPHA * yn).astype(o_ref.dtype)


def conv2d_layer_forward(x_nchw, weight, bias, kh=3, kw=3, pad=1):
    """Conv2DLayer forward: conv3x3(pad=1) -> InstanceNorm2d -> LeakyReLU(0.15).

    x_nchw : (N, Cin, H, W) float32
    weight : (Cout, Cin, kh, kw) float32
    bias   : (Cout,) float32
    returns: (N, Cout, H, W) float32
    """
    N, Cin, H, W = x_nchw.shape
    Cout = weight.shape[0]

    Wp = W + 2 * pad                 # padded width (output keeps these cols)
    Hp = H + 2 * pad + 1             # padded height; +1 extra bottom row keeps
                                     # every statically shifted slice in bounds
    FL = Hp * Wp                     # flattened padded image length
    FLO = H * Wp                     # kernel output lanes (padded-width rows)

    # One cheap zero-pad + reshape instead of a 9x im2col expansion in HBM.
    xpad = jnp.pad(x_nchw.astype(jnp.float32),
                   ((0, 0), (0, 0), (pad, pad + 1), (pad, pad)))
    xf = xpad.reshape(N, Cin, FL)

    # (Cout, Cin, kh, kw) -> (kh*kw, Cout, Cin); tap t = i*kw + j.
    w_taps = jnp.transpose(weight.astype(jnp.float32),
                           (2, 3, 0, 1)).reshape(kh * kw, Cout, Cin)
    b2 = bias.astype(jnp.float32).reshape(Cout, 1)

    # Valid-column mask for the padded-width output layout (cols >= W are pad).
    col = jnp.arange(FLO, dtype=jnp.int32) % Wp
    mask = (col < W).astype(jnp.float32).reshape(1, FLO)

    offs = tuple(i * Wp + j for i in range(kh) for j in range(kw))  # static
    kernel = functools.partial(_conv_in_lrelu_kernel, offs=offs, flo=FLO,
                               inv_hw=1.0 / float(H * W))

    out = pl.pallas_call(
        kernel,
        out_shape=jax.ShapeDtypeStruct((N, Cout, FLO), jnp.float32),
        grid_spec=pltpu.PrefetchScalarGridSpec(
            num_scalar_prefetch=0,
            grid=(N,),
            in_specs=[
                pl.BlockSpec((None, Cin, FL), lambda n: (n, 0, 0)),
                pl.BlockSpec((kh * kw, Cout, Cin), lambda n: (0, 0, 0)),
                pl.BlockSpec((Cout, 1), lambda n: (0, 0)),
                pl.BlockSpec((1, FLO), lambda n: (0, 0)),
            ],
            out_specs=pl.BlockSpec((None, Cout, FLO), lambda n: (n, 0, 0)),
        ),
        compiler_params=pltpu.CompilerParams(
            dimension_semantics=("parallel",),      # megacore on v7x
            vmem_limit_bytes=32 * 1024 * 1024,      # safe on v5e/v6e/v7x
        ),
    )(xf, w_taps, b2, mask)

    # (N, Cout, H*Wp) -> NCHW: free reshape + cheap slice dropping pad columns.
    return out.reshape(N, Cout, H, Wp)[:, :, :, :W]


def _reference(x_nchw, weight, bias, pad=1):
    # Pure-JAX reference for correctness check.
    y = lax.conv_general_dilated(
        x_nchw, weight, window_strides=(1, 1),
        padding=((pad, pad), (pad, pad)),
        dimension_numbers=("NCHW", "OIHW", "NCHW"))
    y = y + bias.reshape(1, -1, 1, 1)
    mean = jnp.mean(y, axis=(2, 3), keepdims=True)
    var = jnp.mean((y - mean) ** 2, axis=(2, 3), keepdims=True)
    yn = (y - mean) * lax.rsqrt(var + EPS)
    return jnp.where(yn >= 0, yn, ALPHA * yn)


if __name__ == "__main__":
    key = jax.random.PRNGKey(0)
    kx, kw_, kb = jax.random.split(key, 3)

    N, Cin, Cout, H, W = 2, 4, 8, 16, 16
    KH = KW = 3

    x = jax.random.normal(kx, (N, Cin, H, W), dtype=jnp.float32)
    # Deterministic parameter init (Kaiming-uniform-like bound, synthetic).
    fan_in = Cin * KH * KW
    bound = 1.0 / jnp.sqrt(fan_in)
    weight = jax.random.uniform(kw_, (Cout, Cin, KH, KW),
                                minval=-bound, maxval=bound,
                                dtype=jnp.float32)
    bias = jax.random.uniform(kb, (Cout,), minval=-bound, maxval=bound,
                              dtype=jnp.float32)

    out = conv2d_layer_forward(x, weight, bias)
    out = jax.block_until_ready(out)

    ref = _reference(x, weight, bias)
    assert out.shape == (N, Cout, H, W)
    assert jnp.allclose(out, ref, atol=1e-4, rtol=1e-4), "mismatch vs reference"

    print("KERNEL_OK")
</pallas_src>

<mosaic_0001>
module attributes {stable_mosaic.version = 11 : i64} {
  func.func @_conv_in_lrelu_kernel(%arg0: i32, %arg1: memref<1x4x342xf32, #tpu.memory_space<vmem>>, %arg2: memref<9x8x4xf32, #tpu.memory_space<vmem>>, %arg3: memref<8x1xf32, #tpu.memory_space<vmem>>, %arg4: memref<1x288xf32, #tpu.memory_space<vmem>>, %arg5: memref<1x8x288xf32, #tpu.memory_space<vmem>>) attributes {dimension_semantics = [#tpu.dimension_semantics<parallel>], iteration_bounds = array<i64: 2>, scalar_prefetch = 0 : i64, scratch_operands = 0 : i64, tpu.core_type = #tpu.core_type<tc>, window_params = [{transform_indices = @transform_0, window_bounds = array<i64: 1, 4, 342>}, {pipeline_mode = #tpu.pipeline_mode<synchronous>, transform_indices = @transform_1, window_bounds = array<i64: 9, 8, 4>}, {pipeline_mode = #tpu.pipeline_mode<synchronous>, transform_indices = @transform_2, window_bounds = array<i64: 8, 1>}, {pipeline_mode = #tpu.pipeline_mode<synchronous>, transform_indices = @transform_3, window_bounds = array<i64: 1, 288>}, {transform_indices = @transform_4, window_bounds = array<i64: 1, 8, 288>}]} {
    %c0 = arith.constant 0 : index
    %c0_0 = arith.constant 0 : index
    %c0_1 = arith.constant 0 : index
    %0 = vector.load %arg1[%c0, %c0_0, %c0_1] : memref<1x4x342xf32, #tpu.memory_space<vmem>>, vector<1x4x288xf32>
    %1 = vector.shape_cast %0 : vector<1x4x288xf32> to vector<4x288xf32>
    %c0_2 = arith.constant 0 : index
    %c0_3 = arith.constant 0 : index
    %c0_4 = arith.constant 0 : index
    %2 = vector.load %arg2[%c0_2, %c0_3, %c0_4] : memref<9x8x4xf32, #tpu.memory_space<vmem>>, vector<1x8x4xf32>
    %3 = vector.shape_cast %2 : vector<1x8x4xf32> to vector<8x4xf32>
    %cst = arith.constant dense<0.000000e+00> : vector<8x288xf32>
    %4 = tpu.matmul %3, %1, %cst {dimension_numbers = #tpu.dot_dimension_numbers<[1], [0], [0], [1], [0, 0, 1, 1], [], []>} : vector<8x4xf32>, vector<4x288xf32>, vector<8x288xf32> -> vector<8x288xf32>
    %c0_5 = arith.constant 0 : index
    %c0_6 = arith.constant 0 : index
    %c1 = arith.constant 1 : index
    %5 = vector.load %arg1[%c0_5, %c0_6, %c1] : memref<1x4x342xf32, #tpu.memory_space<vmem>>, vector<1x4x288xf32>
    %6 = vector.shape_cast %5 : vector<1x4x288xf32> to vector<4x288xf32>
    %c1_7 = arith.constant 1 : index
    %c0_8 = arith.constant 0 : index
    %c0_9 = arith.constant 0 : index
    %7 = vector.load %arg2[%c1_7, %c0_8, %c0_9] : memref<9x8x4xf32, #tpu.memory_space<vmem>>, vector<1x8x4xf32>
    %8 = vector.shape_cast %7 : vector<1x8x4xf32> to vector<8x4xf32>
    %cst_10 = arith.constant dense<0.000000e+00> : vector<8x288xf32>
    %9 = tpu.matmul %8, %6, %cst_10 {dimension_numbers = #tpu.dot_dimension_numbers<[1], [0], [0], [1], [0, 0, 1, 1], [], []>} : vector<8x4xf32>, vector<4x288xf32>, vector<8x288xf32> -> vector<8x288xf32>
    %10 = arith.addf %4, %9 : vector<8x288xf32>
    %c0_11 = arith.constant 0 : index
    %c0_12 = arith.constant 0 : index
    %c2 = arith.constant 2 : index
    %11 = vector.load %arg1[%c0_11, %c0_12, %c2] : memref<1x4x342xf32, #tpu.memory_space<vmem>>, vector<1x4x288xf32>
    %12 = vector.shape_cast %11 : vector<1x4x288xf32> to vector<4x288xf32>
    %c2_13 = arith.constant 2 : index
    %c0_14 = arith.constant 0 : index
    %c0_15 = arith.constant 0 : index
    %13 = vector.load %arg2[%c2_13, %c0_14, %c0_15] : memref<9x8x4xf32, #tpu.memory_space<vmem>>, vector<1x8x4xf32>
    %14 = vector.shape_cast %13 : vector<1x8x4xf32> to vector<8x4xf32>
    %cst_16 = arith.constant dense<0.000000e+00> : vector<8x288xf32>
    %15 = tpu.matmul %14, %12, %cst_16 {dimension_numbers = #tpu.dot_dimension_numbers<[1], [0], [0], [1], [0, 0, 1, 1], [], []>} : vector<8x4xf32>, vector<4x288xf32>, vector<8x288xf32> -> vector<8x288xf32>
    %16 = arith.addf %10, %15 : vector<8x288xf32>
    %c0_17 = arith.constant 0 : index
    %c0_18 = arith.constant 0 : index
    %c18 = arith.constant 18 : index
    %17 = vector.load %arg1[%c0_17, %c0_18, %c18] : memref<1x4x342xf32, #tpu.memory_space<vmem>>, vector<1x4x288xf32>
    %18 = vector.shape_cast %17 : vector<1x4x288xf32> to vector<4x288xf32>
    %c3 = arith.constant 3 : index
    %c0_19 = arith.constant 0 : index
    %c0_20 = arith.constant 0 : index
    %19 = vector.load %arg2[%c3, %c0_19, %c0_20] : memref<9x8x4xf32, #tpu.memory_space<vmem>>, vector<1x8x4xf32>
    %20 = vector.shape_cast %19 : vector<1x8x4xf32> to vector<8x4xf32>
    %cst_21 = arith.constant dense<0.000000e+00> : vector<8x288xf32>
    %21 = tpu.matmul %20, %18, %cst_21 {dimension_numbers = #tpu.dot_dimension_numbers<[1], [0], [0], [1], [0, 0, 1, 1], [], []>} : vector<8x4xf32>, vector<4x288xf32>, vector<8x288xf32> -> vector<8x288xf32>
    %22 = arith.addf %16, %21 : vector<8x288xf32>
    %c0_22 = arith.constant 0 : index
    %c0_23 = arith.constant 0 : index
    %c19 = arith.constant 19 : index
    %23 = vector.load %arg1[%c0_22, %c0_23, %c19] : memref<1x4x342xf32, #tpu.memory_space<vmem>>, vector<1x4x288xf32>
    %24 = vector.shape_cast %23 : vector<1x4x288xf32> to vector<4x288xf32>
    %c4 = arith.constant 4 : index
    %c0_24 = arith.constant 0 : index
    %c0_25 = arith.constant 0 : index
    %25 = vector.load %arg2[%c4, %c0_24, %c0_25] : memref<9x8x4xf32, #tpu.memory_space<vmem>>, vector<1x8x4xf32>
    %26 = vector.shape_cast %25 : vector<1x8x4xf32> to vector<8x4xf32>
    %cst_26 = arith.constant dense<0.000000e+00> : vector<8x288xf32>
    %27 = tpu.matmul %26, %24, %cst_26 {dimension_numbers = #tpu.dot_dimension_numbers<[1], [0], [0], [1], [0, 0, 1, 1], [], []>} : vector<8x4xf32>, vector<4x288xf32>, vector<8x288xf32> -> vector<8x288xf32>
    %28 = arith.addf %22, %27 : vector<8x288xf32>
    %c0_27 = arith.constant 0 : index
    %c0_28 = arith.constant 0 : index
    %c20 = arith.constant 20 : index
    %29 = vector.load %arg1[%c0_27, %c0_28, %c20] : memref<1x4x342xf32, #tpu.memory_space<vmem>>, vector<1x4x288xf32>
    %30 = vector.shape_cast %29 : vector<1x4x288xf32> to vector<4x288xf32>
    %c5 = arith.constant 5 : index
    %c0_29 = arith.constant 0 : index
    %c0_30 = arith.constant 0 : index
    %31 = vector.load %arg2[%c5, %c0_29, %c0_30] : memref<9x8x4xf32, #tpu.memory_space<vmem>>, vector<1x8x4xf32>
    %32 = vector.shape_cast %31 : vector<1x8x4xf32> to vector<8x4xf32>
    %cst_31 = arith.constant dense<0.000000e+00> : vector<8x288xf32>
    %33 = tpu.matmul %32, %30, %cst_31 {dimension_numbers = #tpu.dot_dimension_numbers<[1], [0], [0], [1], [0, 0, 1, 1], [], []>} : vector<8x4xf32>, vector<4x288xf32>, vector<8x288xf32> -> vector<8x288xf32>
    %34 = arith.addf %28, %33 : vector<8x288xf32>
    %c0_32 = arith.constant 0 : index
    %c0_33 = arith.constant 0 : index
    %c36 = arith.constant 36 : index
    %35 = vector.load %arg1[%c0_32, %c0_33, %c36] : memref<1x4x342xf32, #tpu.memory_space<vmem>>, vector<1x4x288xf32>
    %36 = vector.shape_cast %35 : vector<1x4x288xf32> to vector<4x288xf32>
    %c6 = arith.constant 6 : index
    %c0_34 = arith.constant 0 : index
    %c0_35 = arith.constant 0 : index
    %37 = vector.load %arg2[%c6, %c0_34, %c0_35] : memref<9x8x4xf32, #tpu.memory_space<vmem>>, vector<1x8x4xf32>
    %38 = vector.shape_cast %37 : vector<1x8x4xf32> to vector<8x4xf32>
    %cst_36 = arith.constant dense<0.000000e+00> : vector<8x288xf32>
    %39 = tpu.matmul %38, %36, %cst_36 {dimension_numbers = #tpu.dot_dimension_numbers<[1], [0], [0], [1], [0, 0, 1, 1], [], []>} : vector<8x4xf32>, vector<4x288xf32>, vector<8x288xf32> -> vector<8x288xf32>
    %40 = arith.addf %34, %39 : vector<8x288xf32>
    %c0_37 = arith.constant 0 : index
    %c0_38 = arith.constant 0 : index
    %c37 = arith.constant 37 : index
    %41 = vector.load %arg1[%c0_37, %c0_38, %c37] : memref<1x4x342xf32, #tpu.memory_space<vmem>>, vector<1x4x288xf32>
    %42 = vector.shape_cast %41 : vector<1x4x288xf32> to vector<4x288xf32>
    %c7 = arith.constant 7 : index
    %c0_39 = arith.constant 0 : index
    %c0_40 = arith.constant 0 : index
    %43 = vector.load %arg2[%c7, %c0_39, %c0_40] : memref<9x8x4xf32, #tpu.memory_space<vmem>>, vector<1x8x4xf32>
    %44 = vector.shape_cast %43 : vector<1x8x4xf32> to vector<8x4xf32>
    %cst_41 = arith.constant dense<0.000000e+00> : vector<8x288xf32>
    %45 = tpu.matmul %44, %42, %cst_41 {dimension_numbers = #tpu.dot_dimension_numbers<[1], [0], [0], [1], [0, 0, 1, 1], [], []>} : vector<8x4xf32>, vector<4x288xf32>, vector<8x288xf32> -> vector<8x288xf32>
    %46 = arith.addf %40, %45 : vector<8x288xf32>
    %c0_42 = arith.constant 0 : index
    %c0_43 = arith.constant 0 : index
    %c38 = arith.constant 38 : index
    %47 = vector.load %arg1[%c0_42, %c0_43, %c38] : memref<1x4x342xf32, #tpu.memory_space<vmem>>, vector<1x4x288xf32>
    %48 = vector.shape_cast %47 : vector<1x4x288xf32> to vector<4x288xf32>
    %c8 = arith.constant 8 : index
    %c0_44 = arith.constant 0 : index
    %c0_45 = arith.constant 0 : index
    %49 = vector.load %arg2[%c8, %c0_44, %c0_45] : memref<9x8x4xf32, #tpu.memory_space<vmem>>, vector<1x8x4xf32>
    %50 = vector.shape_cast %49 : vector<1x8x4xf32> to vector<8x4xf32>
    %cst_46 = arith.constant dense<0.000000e+00> : vector<8x288xf32>
    %51 = tpu.matmul %50, %48, %cst_46 {dimension_numbers = #tpu.dot_dimension_numbers<[1], [0], [0], [1], [0, 0, 1, 1], [], []>} : vector<8x4xf32>, vector<4x288xf32>, vector<8x288xf32> -> vector<8x288xf32>
    %52 = arith.addf %46, %51 : vector<8x288xf32>
    %c0_47 = arith.constant 0 : index
    %c0_48 = arith.constant 0 : index
    %53 = vector.load %arg3[%c0_47, %c0_48] : memref<8x1xf32, #tpu.memory_space<vmem>>, vector<8x1xf32>
    %54 = vector.broadcast %53 : vector<8x1xf32> to vector<8x288xf32>
    %55 = arith.addf %52, %54 : vector<8x288xf32>
    %c0_49 = arith.constant 0 : index
    %c0_50 = arith.constant 0 : index
    %56 = vector.load %arg4[%c0_49, %c0_50] : memref<1x288xf32, #tpu.memory_space<vmem>>, vector<1x288xf32>
    %57 = vector.broadcast %56 : vector<1x288xf32> to vector<8x288xf32>
    %58 = arith.mulf %55, %57 : vector<8x288xf32>
    %cst_51 = arith.constant dense<0.000000e+00> : vector<8xf32>
    %59 = vector.multi_reduction <add>, %58, %cst_51 [1] : vector<8x288xf32> to vector<8xf32>
    %60 = vector.shape_cast %59 : vector<8xf32> to vector<8x1xf32>
    %cst_52 = arith.constant 3.906250e-03 : f32
    %61 = vector.broadcast %cst_52 : f32 to vector<8x1xf32>
    %62 = arith.mulf %60, %61 : vector<8x1xf32>
    %63 = vector.broadcast %62 : vector<8x1xf32> to vector<8x288xf32>
    %64 = arith.subf %55, %63 : vector<8x288xf32>
    %65 = vector.broadcast %56 : vector<1x288xf32> to vector<8x288xf32>
    %66 = arith.mulf %64, %65 : vector<8x288xf32>
    %67 = arith.mulf %66, %66 : vector<8x288xf32>
    %cst_53 = arith.constant dense<0.000000e+00> : vector<8xf32>
    %68 = vector.multi_reduction <add>, %67, %cst_53 [1] : vector<8x288xf32> to vector<8xf32>
    %69 = vector.shape_cast %68 : vector<8xf32> to vector<8x1xf32>
    %cst_54 = arith.constant 3.906250e-03 : f32
    %70 = vector.broadcast %cst_54 : f32 to vector<8x1xf32>
    %71 = arith.mulf %69, %70 : vector<8x1xf32>
    %cst_55 = arith.constant 9.99999974E-6 : f32
    %72 = vector.broadcast %cst_55 : f32 to vector<8x1xf32>
    %73 = arith.addf %71, %72 : vector<8x1xf32>
    %74 = math.rsqrt %73 : vector<8x1xf32>
    %75 = vector.broadcast %74 : vector<8x1xf32> to vector<8x288xf32>
    %76 = arith.mulf %64, %75 : vector<8x288xf32>
    %cst_56 = arith.constant 0.000000e+00 : f32
    %77 = vector.broadcast %cst_56 : f32 to vector<8x288xf32>
    %78 = arith.cmpf oge, %76, %77 : vector<8x288xf32>
    %cst_57 = arith.constant 1.500000e-01 : f32
    %79 = vector.broadcast %cst_57 : f32 to vector<8x288xf32>
    %80 = arith.mulf %79, %76 : vector<8x288xf32>
    %81 = arith.select %78, %76, %80 : vector<8x288xi1>, vector<8x288xf32>
    %c0_58 = arith.constant 0 : index
    %c0_59 = arith.constant 0 : index
    %c0_60 = arith.constant 0 : index
    %82 = vector.load %arg5[%c0_58, %c0_59, %c0_60] : memref<1x8x288xf32, #tpu.memory_space<vmem>>, vector<1x8x288xf32>
    %83 = vector.shape_cast %82 : vector<1x8x288xf32> to vector<8x288xf32>
    %84 = vector.shape_cast %81 : vector<8x288xf32> to vector<1x8x288xf32>
    tpu.vector_store %arg5[%c0_58, %c0_59, %c0_60], %84 {strides = array<i32>} : memref<1x8x288xf32, #tpu.memory_space<vmem>>, vector<1x8x288xf32>,
    return
  }
  func.func @transform_0(%arg0: i32) -> (i32, i32, i32) {
    %c0_i32 = arith.constant 0 : i32
    %c0_i32_0 = arith.constant 0 : i32
    %c0_i32_1 = arith.constant 0 : i32
    return %arg0, %c0_i32, %c0_i32_0 : i32, i32, i32
  }
  func.func @transform_1(%arg0: i32) -> (i32, i32, i32) {
    %c0_i32 = arith.constant 0 : i32
    %c0_i32_0 = arith.constant 0 : i32
    %c0_i32_1 = arith.constant 0 : i32
    %c0_i32_2 = arith.constant 0 : i32
    return %c0_i32, %c0_i32_0, %c0_i32_1 : i32, i32, i32
  }
  func.func @transform_2(%arg0: i32) -> (i32, i32) {
    %c0_i32 = arith.constant 0 : i32
    %c0_i32_0 = arith.constant 0 : i32
    %c0_i32_1 = arith.constant 0 : i32
    return %c0_i32, %c0_i32_0 : i32, i32
  }
  func.func @transform_3(%arg0: i32) -> (i32, i32) {
    %c0_i32 = arith.constant 0 : i32
    %c0_i32_0 = arith.constant 0 : i32
    %c0_i32_1 = arith.constant 0 : i32
    return %c0_i32, %c0_i32_0 : i32, i32
  }
  func.func @transform_4(%arg0: i32) -> (i32, i32, i32) {
    %c0_i32 = arith.constant 0 : i32
    %c0_i32_0 = arith.constant 0 : i32
    %c0_i32_1 = arith.constant 0 : i32
    return %arg0, %c0_i32, %c0_i32_0 : i32, i32, i32
  }
}

</mosaic_0001>

<bundles_post_ra>
// kernel: tpu_custom_call.1
= control target key start
LH: loop header
LB: loop body
LE: loop exit
PB: predicated region body
PF: predicated region fallthrough
CT: control target
= control target key end

     0   :  { %9 = vsyncpa [#allocation3], 0  ;;  %s2393_s0 = inlined_call_operand.vmem [shape: f32[2,4,342], index: 0, kind: input, shape index: {}]   ;;  %s2394_s1 = inlined_call_operand.vmem [shape: f32[9,8,4], index: 1, kind: input, shape index: {}]   ;;  %s2395_s2 = inlined_call_operand.vmem [shape: f32[8,1], index: 2, kind: input, shape index: {}]   ;;  %s2396_s3 = inlined_call_operand.vmem [shape: f32[1,288], index: 3, kind: input, shape index: {}]   ;;  %s2397_s4 = inlined_call_operand.hbm [shape: f32[2,8,288], index: 4, kind: output, shape index: {}]  }
   0x1   :  { %11 = vsyncpa [#allocation3 + $0x1], 0  ;;  %s2138_s15 = smov 0   ;;  %s2140_s16 = smov 0  }
   0x2   :  { %s2142_s17 = smov 0   ;;  %s2144_s18 = smov 0  }
   0x3 LB: > { %s2159_s19 = sadd.s32 4294967295, %s2099_s18   ;;  %s1840_s20 = sadd.s32 4294967294, %s2099_s18   ;;  %s2099_s18 = sphi %s2144_s18, %s2403_s18   ;;  %s2095_s17 = sphi %s2142_s17, %s2402_s17   ;;  %s2091_s16 = sphi %s2140_s16, %s2401_s16   ;;  %s2087_s15 = sphi %s2138_s15, %s2400_s15  }
   0x4   : > { %s2163_s21 = sadd.s32 1, %s2099_s18   ;;  %s113_s22 = sadd.s32 1, %s2095_s17 }
   0x5   : > { %s110_s23 = ssub.s32 %s2099_s18, %s2163_s21  ;;  %p123_p0 = scmp.ne.s32.totalorder %s2095_s17, %s2091_s16 }
   0x6   : > { %p111_p1 = scmp.eq.s32.totalorder %s110_s23, 0  ;;  %p124_p2 = scmp.eq.s32.totalorder %s2159_s19, 1 }
   0x7   : > { %p129_p3 = scmp.ne.s32.totalorder %s2091_s16, %s2087_s15  ;;  %p130_p4 = scmp.eq.s32.totalorder %s1840_s20, 1 }
   0x8   : > { %s2174_s24 = scalar_select %p111_p1, %s2095_s17, %s113_s22  }
   0x9   : > { %p2176_p5 = por %p124_p2, %p123_p0  ;;  %p2180_p6 = por %p130_p4, %p129_p3 }
   0xa   : > { %p1843_p7 = scmp.ge.s32.totalorder %s2099_s18, 1  ;;  %p165_p8 = scmp.lt.s32.totalorder %s2099_s18, 3 }
   0xc   : > { %p166_p9 = pnand %p1843_p7, %p165_p8 }
   0xd   : > { %p191_p10 = scmp.lt.s32.totalorder (!%p166_p9), %s2159_s19, 1  ;;  %v2101_v0 = vmov (!%p166_p9), 0.0   ;;  %vm2102_vm0 = vmmov (!%p166_p9), 0   ;;  %s2103_s6 = smov (!%p166_p9), 127   ;;  %v1698_v11 = vld [vmem:[%s2395_s2] sm:$0xff] (!%p166_p9)  ;;  %v2111_v12 = vmov (!%p166_p9), 0  }
   0xe   : > { %169 = sbr.rel (%p166_p9) target bundleno = 767 (0x2ff), region = 36  ;;  %1919 = vmatprep.subr.mxu1 (!%p166_p9), %v2101_v0  ;;  %288 = vmatprep.mubr.f32.mxu0 (!%p166_p9), %v2101_v0  ;;  %s2104_s7 = smov (!%p166_p9), 126   ;;  %vm217_vm1 = vcmask (!%p166_p9), 1043456   ;;  %vm210_vm2 = vcmask (!%p166_p9), 1039360   ;;  %v1845_v18 = vld [vmem:[%s2394_s1 + $0x8] sm:$0xff] (!%p166_p9)  ;;  %vm213_vm3 = vcmask (!%p166_p9), 31744  }
   0xf   : > { %1921 = vmatprep.mubr.msk.f32.mxu1 (!%p166_p9), %vm2102_vm0, %v2101_v0  ;;  %s2105_s8 = smov (!%p166_p9), 110   ;;  %s2106_s9 = smov (!%p166_p9), 109   ;;  %2033 = vset.pattern.permute.xlu0 (!%p166_p9), %v2111_v12  ;;  %vm528_vm4 = vcmask (!%p166_p9), 1031168   ;;  %v198_v24 = vld [vmem:[%s2394_s1] sm:$0xff] (!%p166_p9)  ;;  %vm697_vm5 = vcmask (!%p166_p9), 900096   ;;  %v1856_v29 = vld [vmem:[%s2394_s1 + $0x10] sm:$0xff] (!%p166_p9) }
  0x10   : > { %s2107_s10 = smov (!%p166_p9), 108   ;;  %s2108_s11 = smov (!%p166_p9), 92   ;;  %v1862_v32 = vld [vmem:[%s2394_s1 + $0x18] sm:$0xff] (!%p166_p9)  ;;  %vm866_vm6 = vcmask (!%p166_p9), 891904   ;;  %v1868_v34 = vld [vmem:[%s2394_s1 + $0x20] sm:$0xff] (!%p166_p9)  ;;  %v1874_v39 = vld [vmem:[%s2394_s1 + $0x28] sm:$0xff] (!%p166_p9) }
  0x11   : > { %s2109_s12 = smov (!%p166_p9), 91   ;;  %s2110_s13 = smov (!%p166_p9), 90   ;;  %vm1035_vm7 = vcmask (!%p166_p9), 883712   ;;  %v1880_v46 = vld [vmem:[%s2394_s1 + $0x30] sm:$0xff] (!%p166_p9)  ;;  %vm1204_vm8 = vcmask (!%p166_p9), 752640   ;;  %v1886_v49 = vld [vmem:[%s2394_s1 + $0x38] sm:$0xff] (!%p166_p9) }
  0x12   : > { %v1892_v53 = vld [vmem:[%s2394_s1 + $0x40] sm:$0xff] (!%p166_p9)  ;;  %vm1373_vm9 = vcmask (!%p166_p9), 744448   ;;  %vm1542_vm10 = vcmask (!%p166_p9), 736256   ;;  %vm1728_vm11 = vcmask (!%p166_p9), 261120   ;;  %s1982_s30 = smul.u32 (!%p166_p9), 384, %s2159_s19 }
  0x15   : > { %s192_s27 = scalar_select %p191_p10, %s2159_s19, 1 }
  0x17   : > { %s1981_s28 = smul.u32 12, %s192_s27 }
  0x19   : > { %s2193_s5 = scalar_lea.vmem %s2393_s0, %s1981_s28  ;;  %s188_s28 = sand.u32 1, %s2091_s16  }
  0x1a   : > { %v2198_v1 = vld [vmem:[%s2193_s5] sm:$0xff]  ;;  %v2204_v3 = vld [vmem:[%s2193_s5 + $0x8] sm:$0xf]  ;;  %s1980_s29 = smul.u32 24, %s188_s28  ;;  %s1767_s19 = scalar_lea.sflag [#allocation3], %s188_s28 }
  0x1b   : > { %204 = vrot.lane.b32.xlu1 %v2198_v1, %s2103_s6  ;;  %v203_v2 = vcombine.high %v2198_v1, %v2198_v1  ;;  %v516_v4 = vld [vmem:[%s2193_s5 + $0x8] sm:$0xf] }
  0x1c   : > { %v685_v5 = vld [vmem:[%s2193_s5 + $0x8] sm:$0xf] }
  0x1d   : > { %206 = vrot.lane.b32.xlu0 %v203_v2, %s2103_s6  ;;  %v854_v6 = vld [vmem:[%s2193_s5 + $0x8] sm:$0xf] }
  0x1e   : > { %v1023_v7 = vld [vmem:[%s2193_s5 + $0x8] sm:$0xf] }
  0x1f   : > { %524 = vrot.lane.b32.xlu1 %v203_v2, %s2104_s7  ;;  %v1192_v8 = vld [vmem:[%s2193_s5 + $0x8] sm:$0xf] }
  0x20   : > { %v1361_v9 = vld [vmem:[%s2193_s5 + $0x8] sm:$0xf] }
  0x21   : > { %208 = vrot.lane.b32.xlu0 %v2204_v3, %s2103_s6  ;;  %v1530_v10 = vld [vmem:[%s2193_s5 + $0x8] sm:$0xf]  ;;  %s190_s5 = scalar_lea.vmem [#allocation2], %s1980_s29 }
  0x22   : > { %s1781_s6 = sshll.u32 %s190_s5, 4  ;;  %s2352_s6 = int_to_ptr.vmem [resolvable:$true] %s1781_s6 }
  0x23   : > { %522 = vrot.lane.b32.xlu1 %v2198_v1, %s2104_s7 }
  0x25   : > { %526 = vrot.lane.b32.xlu0 %v516_v4, %s2104_s7 }
  0x27   : > { %695 = vrot.lane.b32.xlu1 %v685_v5, %s2105_s8 }
  0x29   : > { %693 = vrot.lane.b32.xlu0 %v203_v2, %s2105_s8 }
  0x2b   : > { %862 = vrot.lane.b32.xlu1 %v203_v2, %s2106_s9 }
  0x2d   : > { %691 = vrot.lane.b32.xlu0 %v2198_v1, %s2105_s8 }
  0x2f   : > { %860 = vrot.lane.b32.xlu1 %v2198_v1, %s2106_s9 }
  0x31   : > { %864 = vrot.lane.b32.xlu0 %v854_v6, %s2106_s9  ;;  %s2350_s9 = scalar_lea.hbm %s2397_s4, %s1982_s30 }
  0x33   : > { %1033 = vrot.lane.b32.xlu1 %v1023_v7, %s2107_s10 }
  0x35   : > { %1031 = vrot.lane.b32.xlu0 %v203_v2, %s2107_s10 }
  0x37   : > { %1200 = vrot.lane.b32.xlu1 %v203_v2, %s2108_s11 }
  0x39   : > { %1029 = vrot.lane.b32.xlu0 %v2198_v1, %s2107_s10  ;;  %s2037_s10 = scalar_lea.vmem %s2352_s6, 384 }
  0x3a   : > { %p2038_p11 = scmp.ne.s32.totalorder %s2352_s6, %s2037_s10 }
  0x3b   : > { %1198 = vrot.lane.b32.xlu1 %v2198_v1, %s2108_s11 }
  0x3c   : > { %p2039_p12 = pnand %p2038_p11, %p2176_p5 }
  0x3d   : > { %1202 = vrot.lane.b32.xlu0 %v1192_v8, %s2108_s11  ;;  %s2112_s11 = smov [#allocation2]  }
  0x3e   : > { %p2040_p13 = pneg %p2039_p12 }
  0x3f   : > { %1371 = vrot.lane.b32.xlu1 %v1361_v9, %s2109_s12 }
  0x41   : > { %1369 = vrot.lane.b32.xlu0 %v203_v2, %s2109_s12 }
  0x43   : > { %1538 = vrot.lane.b32.xlu1 %v203_v2, %s2110_s13 }
  0x45   : > { %1367 = vrot.lane.b32.xlu0 %v2198_v1, %s2109_s12  ;;  %s2041_s12 = sshll.u32 %s2112_s11, 4  ;;  %s2042_s12 = int_to_ptr.vmem [resolvable:$false] %s2041_s12 }
  0x46   : > { %p2044_p0 = scmp.lt.s32.totalorder %s2352_s6, %s2042_s12 }
  0x47   : > { %1536 = vrot.lane.b32.xlu1 %v2198_v1, %s2110_s13 }
  0x49   : > { %1540 = vrot.lane.b32.xlu0 %v1530_v10, %s2110_s13  ;;  %s2043_s13 = scalar_lea.vmem %s2042_s12, 768 }
  0x4a   : > { %p2045_p1 = scmp.lt.s32.totalorder %s2043_s13, %s2037_s10 }
  0x4c   : > { %p2046_p2 = por %p2045_p1, %p2044_p0 }
  0x4d   : > { %1701 = vperm.xlu0 %2033, %v1698_v11  }
  0x4e   : > { %p2047_p3 = pnand %p2046_p2, %p2040_p13 }
  0x8d   : > { %v205_v13 = vpop.permute.xlu1 %204 }
  0x8f   : > { %v207_v14 = vpop.permute.xlu0 %206 }
  0x90   : > { %v211_v19 = vsel %vm210_vm2, %v205_v13, %v207_v14 }
  0x91   : > { %v525_v15 = vpop.permute.xlu1 %524 }
  0x93   : > { %v209_v16 = vpop.permute.xlu0 %208 }
  0x94   : > { %1920 = vmatpush3.msk.msra.mxu1 %vm217_vm1, %v209_v16  ;;  %v212_v17 = vsel %vm210_vm2, %v207_v14, %v209_v16 }
  0x95   : > { %1846 = vmatprep.subr.msk.mxu0 %vm217_vm1, %v212_v17  ;;  %v523_v20 = vpop.permute.xlu1 %522  ;;  %1922 = vmatmul.mubr.msk.f32.vlgmr.msra.gmra.mrb[0].mxu1 %vm213_vm3, %v1845_v18 }
  0x96   : > { %1847 = vmatpush1.msk.msra.mxu0 %vm217_vm1, %v211_v19  ;;  %1924 = vmatprep.subr.mxu1 %v2101_v0  ;;  %v529_v26 = vsel %vm528_vm4, %v523_v20, %v525_v15 }
  0x97   : > { %1848 = vmatmul.mubr.msk.f32.vlgmr.msra.gmra.mrb[0].mxu0 %vm213_vm3, %v1845_v18  ;;  %1851 = vmatprep.subr.msk.mxu0 %vm217_vm1, %v203_v2  ;;  %v527_v21 = vpop.permute.xlu0 %526 }
  0x98   : > { %1852 = vmatpush1.msk.msra.mxu0 %vm217_vm1, %v2198_v1  ;;  %v530_v22 = vsel %vm528_vm4, %v525_v15, %v527_v21  ;;  %1925 = vmatpush3.msk.msra.mxu1 %vm217_vm1, %v2204_v3 }
  0x99   : > { %1857 = vmatprep.subr.msk.mxu0 %vm217_vm1, %v530_v22  ;;  %1926 = vmatprep.mubr.msk.f32.mxu1 %vm2102_vm0, %v2101_v0  ;;  %v696_v23 = vpop.permute.xlu1 %695 }
  0x9a   : > { %1929 = vmatprep.subr.mxu1 %v2101_v0  ;;  %438 = vmatprep.mubr.f32.mxu0 %v2101_v0 }
  0x9b   : > { %1927 = vmatmul.mubr.msk.f32.vlgmr.msra.gmra.mrb[2].mxu1 %vm213_vm3, %v198_v24  ;;  %v694_v25 = vpop.permute.xlu0 %693 }
  0x9c   : > { %1930 = vmatpush3.msk.msra.mxu1 %vm217_vm1, %v527_v21  ;;  %1931 = vmatprep.mubr.msk.f32.mxu1 %vm2102_vm0, %v2101_v0  ;;  %v699_v28 = vsel %vm697_vm5, %v694_v25, %v696_v23 }
  0x9d   : > { %1934 = vmatprep.subr.mxu1 %v2101_v0  ;;  %v863_v27 = vpop.permute.xlu1 %862 }
  0x9f   : > { %1853 = vmatmul.mubr.msk.f32.vlgmr.msra.gmra.mrb[0].mxu0 %vm213_vm3, %v198_v24  ;;  %v692_v30 = vpop.permute.xlu0 %691  ;;  %1932 = vmatmul.mubr.msk.f32.vlgmr.msra.gmra.mrb[4].mxu1 %vm213_vm3, %v1856_v29  ;;  %v1709_v24 = vlaneseq }
  0xa0   : > { %1858 = vmatpush1.msk.msra.mxu0 %vm217_vm1, %v529_v26  ;;  %604 = vmatprep.mubr.f32.mxu0 %v2101_v0  ;;  %v698_v35 = vsel %vm697_vm5, %v692_v30, %v694_v25 }
  0xa1   : > { %1863 = vmatprep.subr.msk.mxu0 %vm217_vm1, %v699_v28  ;;  %1935 = vmatpush3.msk.msra.mxu1 %vm217_vm1, %v696_v23  ;;  %v861_v31 = vpop.permute.xlu1 %860  ;;  %v1710_v25 = vshrl.u32 %v1709_v24, 7 }
  0xa2   : > { %1936 = vmatprep.mubr.msk.f32.mxu1 %vm2102_vm0, %v2101_v0  ;;  %1939 = vmatprep.subr.mxu1 %v2101_v0  ;;  %v867_v42 = vsel %vm866_vm6, %v861_v31, %v863_v27 }
  0xa3   : > { %v865_v33 = vpop.permute.xlu0 %864  ;;  %1937 = vmatmul.mubr.msk.f32.vlgmr.msra.gmra.mrb[6].mxu1 %vm213_vm3, %v1862_v32  ;;  %v1711_v26 = vsub.s32 0, %v1710_v25  ;;  %v1715_v30 = vsub.s32 1, %v1710_v25 }
  0xa4   : > { %1940 = vmatpush3.msk.msra.mxu1 %vm217_vm1, %v865_v33  ;;  %1941 = vmatprep.mubr.msk.f32.mxu1 %vm2102_vm0, %v2101_v0  ;;  %v868_v37 = vsel %vm866_vm6, %v863_v27, %v865_v33  ;;  %v1719_v27 = vsub.s32 2, %v1710_v25 }
  0xa5   : > { %v1034_v36 = vpop.permute.xlu1 %1033  ;;  %1944 = vmatprep.subr.mxu1 %v2101_v0 }
  0xa7   : > { %1859 = vmatmul.mubr.msk.f32.vlgmr.msra.gmra.mrb[0].mxu0 %vm213_vm3, %v1856_v29  ;;  %v1032_v38 = vpop.permute.xlu0 %1031  ;;  %1942 = vmatmul.mubr.msk.f32.vlgmr.msra.gmra.mrb[8].mxu1 %vm213_vm3, %v1868_v34  ;;  %v1707_v29 = vld [vmem:[%s2396_s3] sm:$0x7] }
  0xa8   : > { %1864 = vmatpush1.msk.msra.mxu0 %vm217_vm1, %v698_v35  ;;  %773 = vmatprep.mubr.f32.mxu0 %v2101_v0  ;;  %v1037_v44 = vsel %vm1035_vm7, %v1032_v38, %v1034_v36  ;;  %v1720_v33 = vrot.slane %v1707_v29, %v1719_v27  ;;  %v1716_v35 = vrot.slane %v1707_v29, %v1715_v30 }
  0xa9   : > { %1869 = vmatprep.subr.msk.mxu0 %vm217_vm1, %v868_v37  ;;  %v1201_v40 = vpop.permute.xlu1 %1200  ;;  %1945 = vmatpush3.msk.msra.mxu1 %vm217_vm1, %v1034_v36 }
  0xaa   : > { %1946 = vmatprep.mubr.msk.f32.mxu1 %vm2102_vm0, %v2101_v0  ;;  %1949 = vmatprep.subr.mxu1 %v2101_v0 }
  0xab   : > { %v1030_v41 = vpop.permute.xlu0 %1029  ;;  %1947 = vmatmul.mubr.msk.f32.vlgmr.msra.gmra.mrb[10].mxu1 %vm213_vm3, %v1874_v39 }
  0xac   : > { %1951 = vmatprep.mubr.msk.f32.mxu1 %vm2102_vm0, %v2101_v0  ;;  %v1036_v50 = vsel %vm1035_vm7, %v1030_v41, %v1032_v38 }
  0xad   : > { %v1199_v43 = vpop.permute.xlu1 %1198 }
  0xae   : > { %v1205_v55 = vsel %vm1204_vm8, %v1199_v43, %v1201_v40 }
  0xaf   : > { %1865 = vmatmul.mubr.msk.f32.vlgmr.msra.gmra.mrb[0].mxu0 %vm213_vm3, %v1862_v32  ;;  %v1203_v45 = vpop.permute.xlu0 %1202  ;;  %v1712_v32 = vrot.slane %v1707_v29, %v1711_v26 }
  0xb0   : > { %1870 = vmatpush1.msk.msra.mxu0 %vm217_vm1, %v867_v42  ;;  %942 = vmatprep.mubr.f32.mxu0 %v2101_v0  ;;  %v1206_v51 = vsel %vm1204_vm8, %v1201_v40, %v1203_v45 }
  0xb1   : > { %1875 = vmatprep.subr.msk.mxu0 %vm217_vm1, %v1037_v44  ;;  %1950 = vmatpush3.msk.msra.mxu1 %vm217_vm1, %v1203_v45  ;;  %v1372_v47 = vpop.permute.xlu1 %1371 }
  0xb2   : > { %1952 = vmatmul.mubr.msk.f32.vlgmr.msra.gmra.mrb[12].mxu1 %vm213_vm3, %v1880_v46  ;;  %1954 = vmatprep.subr.mxu1 %v2101_v0 }
  0xb3   : > { %v1370_v48 = vpop.permute.xlu0 %1369  ;;  %1955 = vmatpush3.msk.msra.mxu1 %vm217_vm1, %v1372_v47  ;;  %1956 = vmatprep.mubr.msk.f32.mxu1 %vm2102_vm0, %v2101_v0 }
  0xb4   : > { %1959 = vmatprep.subr.mxu1 %v2101_v0  ;;  %v1375_v56 = vsel %vm1373_vm9, %v1370_v48, %v1372_v47 }
  0xb5   : > { %v1539_v57 = vpop.permute.xlu1 %1538 }
  0xb6   : > { %1957 = vmatmul.mubr.msk.f32.vlgmr.msra.gmra.mrb[14].mxu1 %vm213_vm3, %v1886_v49 }
  0xb7   : > { %1871 = vmatmul.mubr.msk.f32.vlgmr.msra.gmra.mrb[0].mxu0 %vm213_vm3, %v1868_v34  ;;  %v1368_v52 = vpop.permute.xlu0 %1367  ;;  %1961 = vmatprep.mubr.msk.f32.mxu1 %vm2102_vm0, %v2101_v0 }
  0xb8   : > { %1876 = vmatpush1.msk.msra.mxu0 %vm217_vm1, %v1036_v50  ;;  %1111 = vmatprep.mubr.f32.mxu0 %v2101_v0  ;;  %v1374_v58 = vsel %vm1373_vm9, %v1368_v52, %v1370_v48 }
  0xb9   : > { %1881 = vmatprep.subr.msk.mxu0 %vm217_vm1, %v1206_v51  ;;  %v1537_v60 = vpop.permute.xlu1 %1536 }
  0xba   : > { %v1543_v61 = vsel %vm1542_vm10, %v1537_v60, %v1539_v57 }
  0xbb   : > { %v1541_v54 = vpop.permute.xlu0 %1540 }
  0xbc   : > { %1960 = vmatpush3.msk.msra.mxu1 %vm217_vm1, %v1541_v54  ;;  %v1544_v59 = vsel %vm1542_vm10, %v1539_v57, %v1541_v54 }
  0xbd   : > { %1962 = vmatmul.mubr.msk.f32.vlgmr.msra.gmra.mrb[16].mxu1 %vm213_vm3, %v1892_v53 }
  0xbf   : > { %1877 = vmatmul.mubr.msk.f32.vlgmr.msra.gmra.mrb[0].mxu0 %vm213_vm3, %v1874_v39 }
  0xc0   : > { %1882 = vmatpush1.msk.msra.mxu0 %vm217_vm1, %v1205_v55  ;;  %1280 = vmatprep.mubr.f32.mxu0 %v2101_v0 }
  0xc1   : > { %1887 = vmatprep.subr.msk.mxu0 %vm217_vm1, %v1375_v56 }
  0xc7   : > { %1883 = vmatmul.mubr.msk.f32.vlgmr.msra.gmra.mrb[0].mxu0 %vm213_vm3, %v1880_v46 }
  0xc8   : > { %1888 = vmatpush1.msk.msra.mxu0 %vm217_vm1, %v1374_v58  ;;  %1449 = vmatprep.mubr.f32.mxu0 %v2101_v0 }
  0xc9   : > { %1893 = vmatprep.subr.msk.mxu0 %vm217_vm1, %v1544_v59 }
  0xcc   : > { %v1702_v28 = vpop.permute.xlu0 %1701 }
  0xcf   : > { %1889 = vmatmul.mubr.msk.f32.vlgmr.msra.gmra.mrb[0].mxu0 %vm213_vm3, %v1886_v49 }
  0xd0   : > { %1894 = vmatpush1.msk.msra.mxu0 %vm217_vm1, %v1543_v61  ;;  %1618 = vmatprep.mubr.f32.mxu0 %v2101_v0 }
  0xd7   : > { %1895 = vmatmul.mubr.msk.f32.vlgmr.msra.gmra.mrb[0].mxu0 %vm213_vm3, %v1892_v53 }
 0x168   : > { %v361_v62 = vpop.f32.mrb[0].mxu1 }
 0x169   : > { %v1923_v63 = vpop.f32.mrb[1].mxu1 }
 0x16e   : > { %v511_v1 = vpop.f32.mrb[2].mxu1 }
 0x16f   : > { %v512_v2 = vadd.f32 %v511_v1, %v361_v62  ;;  %v1928_v3 = vpop.f32.mrb[3].mxu1 }
 0x172   : > { %v677_v4 = vpop.f32.mrb[4].mxu1 }
 0x173   : > { %v683_v5 = vadd.f32 %v677_v4, %v512_v2  ;;  %v1933_v6 = vpop.f32.mrb[5].mxu1 }
 0x176   : > { %v846_v7 = vpop.f32.mrb[6].mxu1 }
 0x177   : > { %v852_v8 = vadd.f32 %v846_v7, %v683_v5  ;;  %v1938_v9 = vpop.f32.mrb[7].mxu1 }
 0x17a   : > { %v1015_v10 = vpop.f32.mrb[8].mxu1 }
 0x17b   : > { %v1021_v11 = vadd.f32 %v1015_v10, %v852_v8  ;;  %v1943_v12 = vpop.f32.mrb[9].mxu1 }
 0x17e   : > { %v1184_v13 = vpop.f32.mrb[10].mxu1 }
 0x17f   : > { %v1190_v14 = vadd.f32 %v1184_v13, %v1021_v11  ;;  %v1948_v15 = vpop.f32.mrb[11].mxu1 }
 0x185   : > { %v1353_v0 = vpop.f32.mrb[12].mxu1 }
 0x186   : > { %v1359_v16 = vadd.f32 %v1353_v0, %v1190_v14  ;;  %v1953_v17 = vpop.f32.mrb[13].mxu1 }
 0x189   : > { %v1522_v18 = vpop.f32.mrb[14].mxu1 }
 0x18a   : > { %v1528_v19 = vadd.f32 %v1522_v18, %v1359_v16  ;;  %v1958_v20 = vpop.f32.mrb[15].mxu1 }
 0x190   : > { %v1691_v21 = vpop.f32.mrb[16].mxu1 }
 0x191   : > { %v1697_v22 = vadd.f32 %v1691_v21, %v1528_v19  ;;  %v1963_v23 = vpop.f32.mrb[17].mxu1 }
 0x193   : > { %v1706_v31 = vadd.f32 %v1702_v28, %v1697_v22 }
 0x195   : > { %v1726_v40 = vmul.f32 %v1720_v33, %v1706_v31 }
 0x197   : > { %v1729_v43 = vsel %vm1728_vm11, %v1726_v40, 0.0 }
 0x1aa   : > { %v1620_v34 = vpop.f32.mrb[0].mxu0 }
 0x1ab   : > { %v1704_v36 = vadd.f32 %v1702_v28, %v1620_v34  ;;  %v1622_v37 = vpop.f32.mrb[1].mxu0 }
 0x1ac   : > { %v1705_v38 = vadd.f32 %v1702_v28, %v1622_v37 }
 0x1ad   : > { %v1724_v39 = vmul.f32 %v1712_v32, %v1704_v36 }
 0x1ae   : > { %v1725_v41 = vmul.f32 %v1716_v35, %v1705_v38 }
 0x1b0   : > { %v1727_v42 = vadd.f32 %v1725_v41, %v1724_v39 }
 0x1b2   : > { %v1730_v44 = vadd.f32 %v1729_v43, %v1727_v42 }
 0x1b4   : > { %1731 = vadd.xlane.f32.xlu1 %v1730_v44 }
 0x241   : > { %v1732_v45 = vpop.xlane.xlu1 %1731 }
 0x242   : > { %v1733_v46 = vmul.f32 0.00390625, %v1732_v45 }
 0x244   : > { %v1734_v47 = vsub.f32 %v1704_v36, %v1733_v46  ;;  %v1735_v48 = vsub.f32 %v1705_v38, %v1733_v46  ;;  %v1736_v49 = vsub.f32 %v1706_v31, %v1733_v46 }
 0x246   : > { %v1737_v50 = vmul.f32 %v1734_v47, %v1712_v32  ;;  %v1738_v51 = vmul.f32 %v1735_v48, %v1716_v35  ;;  %v1739_v52 = vmul.f32 %v1736_v49, %v1720_v33 }
 0x248   : > { %v1740_v53 = vmul.f32 %v1737_v50, %v1737_v50  ;;  %v1741_v54 = vmul.f32 %v1738_v51, %v1738_v51  ;;  %v1742_v55 = vmul.f32 %v1739_v52, %v1739_v52 }
 0x24a   : > { %v1743_v56 = vadd.f32 %v1741_v54, %v1740_v53  ;;  %v1744_v57 = vsel %vm1728_vm11, %v1742_v55, 0.0 }
 0x24c   : > { %v1745_v58 = vadd.f32 %v1744_v57, %v1743_v56 }
 0x24e   : > { %1746 = vadd.xlane.f32.xlu0 %v1745_v58 }
 0x2db   : > { %v1747_v59 = vpop.xlane.xlu0 %1746 }
 0x2dc   : > { %v1748_v60 = vmul.f32 0.00390625, %v1747_v59 }
 0x2de   : > { %v1749_v61 = vadd.f32 1e-05, %v1748_v60 }
 0x2e0   : > { %2035 = vrsqrt.f32 %v1749_v61 }
 0x2ea   : > { %v2036_v62 = vpop.eup %2035 }
 0x2eb   : > { %v1751_v63 = vmul.f32 %v2036_v62, %v1734_v47  ;;  %v1752_v1 = vmul.f32 %v2036_v62, %v1735_v48  ;;  %v1753_v2 = vmul.f32 %v2036_v62, %v1736_v49 }
 0x2ed   : > { %vm1754_vm12 = vcmp.ge.f32.partialorder %v1751_v63, 0.0  ;;  %vm1755_vm13 = vcmp.ge.f32.partialorder %v1752_v1, 0.0  ;;  %vm1756_vm14 = vcmp.ge.f32.partialorder %v1753_v2, 0.0  ;;  %v1757_v3 = vmul.f32 0.15, %v1751_v63 }
 0x2ee   : > { %v1758_v4 = vmul.f32 0.15, %v1752_v1  ;;  %v1759_v5 = vmul.f32 0.15, %v1753_v2 }
 0x2ef   : > { %v1760_v6 = vsel %vm1754_vm12, %v1751_v63, %v1757_v3 }
 0x2f0   : > { %v1761_v7 = vsel %vm1755_vm13, %v1752_v1, %v1758_v4  ;;  %v1762_v8 = vsel %vm1756_vm14, %v1753_v2, %v1759_v5  ;;  %1763 = vst [vmem:[%s190_s5] sm:$0xff] %v1760_v6 }
 0x2f1   : > { %1764 = vst [vmem:[%s190_s5 + $0x8] sm:$0xff] %v1761_v7  ;;  %1765 = vst.msk [vmem:[%s190_s5 + $0x10] sm:$0xff] %vm1728_vm11, %v1762_v8 }
 0x2f2   : > { %2050 = shalt.err (!%p2047_p3)
}
 0x2f3   : > { %s2051_s14 = scalar_lea.hbm %s2350_s9, 384  ;;  %s2055_s23 = scalar_lea.hbm %s2397_s4, 768 }
 0x2f4   : > { %p2052_p4 = scmp.ne.s32.totalorder %s2350_s9, %s2051_s14  ;;  %p2056_p9 = scmp.lt.u32.totalorder %s2350_s9, %s2397_s4 }
 0x2f5   : > { %p2057_p10 = scmp.lt.u32.totalorder %s2055_s23, %s2051_s14  ;;  %p2059_p12 = scmp.lt.u32.totalorder %s2051_s14, %s2350_s9 }
 0x2f6   : > { %p2053_p7 = pnand %p2052_p4, %p2176_p5 }
 0x2f7   : > { %p2058_p11 = por %p2057_p10, %p2056_p9 }
 0x2f8   : > { %p2054_p8 = pneg %p2053_p7 }
 0x2f9   : > { %p2060_p13 = por %p2059_p12, %p2058_p11 }
 0x2fb   : > { %p2061_p0 = pnand %p2060_p13, %p2054_p8 }
 0x2fd   : > { %2064 = shalt.err (!%p2061_p0)
}
 0x2fe   : > { %1983 = dma.vmem_to_hbm [thread:$0]  (%p2176_p5), %s2352_s6, 384, %s2350_s9, %s1767_s19  }
 0x2ff PF: > { %p1989_p1 = scmp.ge.s32.totalorder %s2099_s18, 2  ;;  %s1793_s29 = sand.u32 1, %s2087_s15  }
 0x300   : > { %s1794_s30 = scalar_lea.sflag [#allocation3], %s1793_s29 }
 0x301   : > { %p1986_p2 = pnand %p1989_p1, %p2180_p6 }
 0x303   : > { %2082 = dma.done.wait (!%p1986_p2), %s1794_s30, 384  }
 0x304   : > { %2084 = vsyncadd (!%p1986_p2), %s1794_s30, 4294966912  ;;  %p14_p3 = scmp.ge.s32.totalorder %s2163_s21, 4   ;;  %s2400_s15 = smov %s2091_s16 }
 0x305   : > { %s2401_s16 = smov %s2095_s17  ;;  %s2402_s17 = smov %s2174_s24 }
 0x306   : > { %s2403_s18 = smov %s2163_s21  ;;  %16 = sbr.rel (!%p14_p3) target bundleno = 3 (0x3), region = 79 }
 0x30d   :  { %1799 = vsyncpa [#allocation3], 1 }
 0x30e   :  { %1801 = vsyncpa [#allocation3 + $0x1], 1 }

</bundles_post_ra>
